<compile_context>
chip_gen: v7x
topology: tpu7x:2x2x1
jax: 0.10.0
libtpu: 0.0.40
codegen_flags: <defaults>
</compile_context>

<pallas_src>
import functools
import math

import jax
import jax.numpy as jnp
from jax.experimental import pallas as pl
from jax.experimental.pallas import tpu as pltpu

_LANES = 128     # TPU vreg lane width
_SUBLANES = 8    # TPU vreg sublane count


def _round_up(x, m):
    return ((x + m - 1) // m) * m


def _wbce_partial_kernel(yt_ref, yp_ref, acc_ref, *, weight_positive,
                         steps_per_slot, last_tile, last_tile_valid):
    """One grid step: un-negated weighted BCE on a (tile_rows, 128) tile,
    accumulated into this parallel slot's resident (8, 128) accumulator."""
    p = pl.program_id(0)          # parallel (megacore) slot
    i = pl.program_id(1)          # step within this slot
    t = p * steps_per_slot + i    # global row-tile index (small scalar)

    @pl.when(i == 0)
    def _init():
        acc_ref[...] = jnp.zeros_like(acc_ref)

    # Inputs arrive in native dtype; the cast is free VPU filler in-kernel.
    yt = yt_ref[...].astype(jnp.float32)
    yp = yp_ref[...].astype(jnp.float32)

    la = jnp.log(yp + 1e-7)            # EUP
    lb = jnp.log(1.0 - yp + 1e-7)      # EUP
    # Un-negated loss:  w*yt*la + (1-yt)*lb  ==  lb + yt*(w*la - lb)
    val = lb + yt * (weight_positive * la - lb)

    tr, lanes = val.shape
    # (tile_rows,128) -> (tile_rows//8, 8, 128) is layout-preserving; the
    # leading-axis sum is plain VPU vreg adds (no XLU cross-sublane reduce).

    @pl.when(t < last_tile)
    def _full_tile():
        acc_ref[...] += jnp.sum(
            val.reshape(tr // _SUBLANES, _SUBLANES, lanes), axis=0)

    @pl.when(t == last_tile)
    def _ragged_tile():
        # Tile-local coordinates: small int32, no global flat-index overflow.
        row = jax.lax.broadcasted_iota(jnp.int32, val.shape, 0)
        col = jax.lax.broadcasted_iota(jnp.int32, val.shape, 1)
        idx = row * lanes + col
        # Select (not multiply) so NaN/Inf from log(garbage) cannot propagate.
        masked = jnp.where(idx < last_tile_valid, val, 0.0)
        acc_ref[...] += jnp.sum(
            masked.reshape(tr // _SUBLANES, _SUBLANES, lanes), axis=0)
    # t > last_tile (overflow tiles of the parallel split; index_map clamps
    # their DMA to the last real tile): contribute nothing.


def weighted_binary_cross_entropy_loss(y_true, y_pred, weight_positive,
                                       *, max_tile_rows=4096, num_parallel=2,
                                       use_pallas=None):
    """mean(-(w * y * log(p + 1e-7) + (1 - y) * log(1 - p + 1e-7)))."""
    assert y_true.shape == y_pred.shape
    total = int(math.prod(y_true.shape))
    assert total > 0

    if use_pallas is None:
        # Small inputs: launch/wrapper overhead dominates; fused XLA wins.
        use_pallas = total >= (1 << 18)
    if not use_pallas:
        yt = y_true.astype(jnp.float32)
        yp = y_pred.astype(jnp.float32)
        loss = -(weight_positive * yt * jnp.log(yp + 1e-7)
                 + (1.0 - yt) * jnp.log(1.0 - yp + 1e-7))
        return jnp.mean(loss)

    # Lane-dense 2D view (rows, 128) in NATIVE dtype.  Only pad by < 128
    # elements when total % 128 != 0 (masked in-kernel).
    rows = pl.cdiv(total, _LANES)
    pad = rows * _LANES - total
    yt = y_true.reshape(-1)
    yp = y_pred.reshape(-1)
    if pad:
        yt = jnp.pad(yt, (0, pad))
        yp = jnp.pad(yp, (0, pad))
    yt2 = yt.reshape(rows, _LANES)
    yp2 = yp.reshape(rows, _LANES)

    tile_rows = max(_SUBLANES, min(_round_up(rows, _SUBLANES),
                                   _round_up(max_tile_rows, _SUBLANES)))
    num_tiles = pl.cdiv(rows, tile_rows)            # last tile may be ragged
    nc = max(1, int(num_parallel))                  # megacore slots (v7x: 2)
    steps = pl.cdiv(num_tiles, nc)                  # inner steps per slot
    last_tile = num_tiles - 1
    last_tile_valid = total - last_tile * tile_rows * _LANES   # static int

    def in_map(p, i):
        # Clamp the parallel split's overflow tiles to the last real tile so
        # the DMA stays in bounds; the kernel accumulates nothing for them.
        return (jnp.minimum(p * steps + i, last_tile), 0)

    partial = pl.pallas_call(
        functools.partial(_wbce_partial_kernel,
                          weight_positive=float(weight_positive),
                          steps_per_slot=steps,
                          last_tile=last_tile,
                          last_tile_valid=last_tile_valid),
        out_shape=jax.ShapeDtypeStruct((nc * _SUBLANES, _LANES), jnp.float32),
        grid_spec=pltpu.PrefetchScalarGridSpec(
            num_scalar_prefetch=0,
            grid=(nc, steps),
            in_specs=[
                pl.BlockSpec((tile_rows, _LANES), in_map),
                pl.BlockSpec((tile_rows, _LANES), in_map),
            ],
            out_specs=pl.BlockSpec((_SUBLANES, _LANES), lambda p, i: (p, 0)),
        ),
        compiler_params=pltpu.CompilerParams(
            dimension_semantics=("parallel", "arbitrary"),
            vmem_limit_bytes=32 * 1024 * 1024,
        ),
    )(yt2, yp2)

    # Negation and mean folded out of the per-element kernel work.
    return -jnp.sum(partial) / jnp.float32(total)


if __name__ == "__main__":
    key = jax.random.PRNGKey(0)
    k1, k2, k3, k4 = jax.random.split(key, 4)

    def ref_loss(y_true, y_pred, w):
        yt = y_true.astype(jnp.float32)
        yp = y_pred.astype(jnp.float32)
        return jnp.mean(-(w * yt * jnp.log(yp + 1e-7)
                          + (1.0 - yt) * jnp.log(1.0 - yp + 1e-7)))

    # Test 1: small, 128-aligned shape; force the Pallas path.
    shape1 = (2, 4, 16, 16)
    yt1 = (jax.random.uniform(k1, shape1) < 0.3).astype(jnp.float32)
    yp1 = jax.nn.sigmoid(jax.random.normal(k2, shape1, jnp.float32))
    w1 = 2.0
    fn1 = jax.jit(functools.partial(weighted_binary_cross_entropy_loss,
                                    weight_positive=w1, use_pallas=True))
    loss1 = fn1(yt1, yp1)
    jax.block_until_ready(loss1)
    ref1 = ref_loss(yt1, yp1, w1)
    assert jnp.allclose(loss1, ref1, rtol=1e-5, atol=1e-5), (float(loss1),
                                                             float(ref1))

    # Test 2: non-128-aligned total (ragged last tile), multiple row-tiles and
    # the parallel (megacore) split; small tile size to exercise accumulation.
    shape2 = (4, 3, 100, 100)          # 120000 elements, 120000 % 128 == 64
    yt2_in = (jax.random.uniform(k3, shape2) < 0.25).astype(jnp.float32)
    yp2_in = jax.nn.sigmoid(jax.random.normal(k4, shape2, jnp.float32))
    w2 = 1.7
    fn2 = jax.jit(functools.partial(weighted_binary_cross_entropy_loss,
                                    weight_positive=w2, use_pallas=True,
                                    max_tile_rows=128))
    loss2 = fn2(yt2_in, yp2_in)
    jax.block_until_ready(loss2)
    ref2 = ref_loss(yt2_in, yp2_in, w2)
    assert jnp.allclose(loss2, ref2, rtol=1e-5, atol=1e-5), (float(loss2),
                                                             float(ref2))

    # Test 3: auto small-input fast path (plain jnp, no pallas_call).
    fn3 = jax.jit(functools.partial(weighted_binary_cross_entropy_loss,
                                    weight_positive=w1))
    loss3 = fn3(yt1, yp1)
    jax.block_until_ready(loss3)
    assert jnp.allclose(loss3, ref1, rtol=1e-5, atol=1e-5)

    print("KERNEL_OK")
</pallas_src>

<mosaic_0001>
module attributes {stable_mosaic.version = 11 : i64} {
  func.func @_wbce_partial_kernel(%arg0: i32, %arg1: i32, %arg2: memref<16x128xf32, #tpu.memory_space<vmem>>, %arg3: memref<16x128xf32, #tpu.memory_space<vmem>>, %arg4: memref<8x128xf32, #tpu.memory_space<vmem>>) attributes {dimension_semantics = [#tpu.dimension_semantics<parallel>, #tpu.dimension_semantics<arbitrary>], iteration_bounds = array<i64: 2, 1>, scalar_prefetch = 0 : i64, scratch_operands = 0 : i64, tpu.core_type = #tpu.core_type<tc>, window_params = [{transform_indices = @transform_0, window_bounds = array<i64: 16, 128>}, {transform_indices = @transform_1, window_bounds = array<i64: 16, 128>}, {transform_indices = @transform_2, window_bounds = array<i64: 8, 128>}]} {
    %c1_i32 = arith.constant 1 : i32
    %0 = arith.muli %arg0, %c1_i32 : i32
    %1 = arith.addi %0, %arg1 : i32
    %c0_i32 = arith.constant 0 : i32
    %2 = arith.cmpi eq, %arg1, %c0_i32 : i32
    %3 = arith.extui %2 : i1 to i32
    %c0_i32_0 = arith.constant 0 : i32
    %4 = arith.cmpi ne, %3, %c0_i32_0 : i32
    scf.if %4 {
      %cst_11 = arith.constant 0.000000e+00 : f32
      %26 = vector.broadcast %cst_11 : f32 to vector<8x128xf32>
      %c0_12 = arith.constant 0 : index
      %c0_13 = arith.constant 0 : index
      %27 = vector.load %arg4[%c0_12, %c0_13] : memref<8x128xf32, #tpu.memory_space<vmem>>, vector<8x128xf32>
      tpu.vector_store %arg4[%c0_12, %c0_13], %26 {strides = array<i32>} : memref<8x128xf32, #tpu.memory_space<vmem>>, vector<8x128xf32>,
    } else {
    }
    %c0 = arith.constant 0 : index
    %c0_1 = arith.constant 0 : index
    %5 = vector.load %arg2[%c0, %c0_1] : memref<16x128xf32, #tpu.memory_space<vmem>>, vector<16x128xf32>
    %c0_2 = arith.constant 0 : index
    %c0_3 = arith.constant 0 : index
    %6 = vector.load %arg3[%c0_2, %c0_3] : memref<16x128xf32, #tpu.memory_space<vmem>>, vector<16x128xf32>
    %cst = arith.constant 1.000000e-07 : f32
    %7 = vector.broadcast %cst : f32 to vector<16x128xf32>
    %8 = arith.addf %6, %7 : vector<16x128xf32>
    %9 = math.log %8 : vector<16x128xf32>
    %cst_4 = arith.constant 1.000000e+00 : f32
    %10 = vector.broadcast %cst_4 : f32 to vector<16x128xf32>
    %11 = arith.subf %10, %6 : vector<16x128xf32>
    %cst_5 = arith.constant 1.000000e-07 : f32
    %12 = vector.broadcast %cst_5 : f32 to vector<16x128xf32>
    %13 = arith.addf %11, %12 : vector<16x128xf32>
    %14 = math.log %13 : vector<16x128xf32>
    %cst_6 = arith.constant 2.000000e+00 : f32
    %15 = vector.broadcast %cst_6 : f32 to vector<16x128xf32>
    %16 = arith.mulf %15, %9 : vector<16x128xf32>
    %17 = arith.subf %16, %14 : vector<16x128xf32>
    %18 = arith.mulf %5, %17 : vector<16x128xf32>
    %19 = arith.addf %14, %18 : vector<16x128xf32>
    %c0_i32_7 = arith.constant 0 : i32
    %20 = arith.cmpi slt, %1, %c0_i32_7 : i32
    %21 = arith.extui %20 : i1 to i32
    %c0_i32_8 = arith.constant 0 : i32
    %22 = arith.cmpi ne, %21, %c0_i32_8 : i32
    scf.if %22 {
      %c0_11 = arith.constant 0 : index
      %c0_12 = arith.constant 0 : index
      %26 = vector.load %arg4[%c0_11, %c0_12] : memref<8x128xf32, #tpu.memory_space<vmem>>, vector<8x128xf32>
      %27 = vector.shape_cast %19 : vector<16x128xf32> to vector<2x8x128xf32>
      %cst_13 = arith.constant dense<0.000000e+00> : vector<8x128xf32>
      %28 = vector.multi_reduction <add>, %27, %cst_13 [0] : vector<2x8x128xf32> to vector<8x128xf32>
      %29 = arith.addf %26, %28 : vector<8x128xf32>
      %c0_14 = arith.constant 0 : index
      %c0_15 = arith.constant 0 : index
      %30 = vector.load %arg4[%c0_14, %c0_15] : memref<8x128xf32, #tpu.memory_space<vmem>>, vector<8x128xf32>
      tpu.vector_store %arg4[%c0_14, %c0_15], %29 {strides = array<i32>} : memref<8x128xf32, #tpu.memory_space<vmem>>, vector<8x128xf32>,
    } else {
    }
    %c0_i32_9 = arith.constant 0 : i32
    %23 = arith.cmpi eq, %1, %c0_i32_9 : i32
    %24 = arith.extui %23 : i1 to i32
    %c0_i32_10 = arith.constant 0 : i32
    %25 = arith.cmpi ne, %24, %c0_i32_10 : i32
    scf.if %25 {
      %26 = tpu.iota {dimensions = array<i32: 0>} : vector<16x128xi32>
      %27 = tpu.iota {dimensions = array<i32: 1>} : vector<16x128xi32>
      %c128_i32 = arith.constant 128 : i32
      %28 = vector.broadcast %c128_i32 : i32 to vector<16x128xi32>
      %29 = arith.muli %26, %28 : vector<16x128xi32>
      %30 = arith.addi %29, %27 : vector<16x128xi32>
      %c2048_i32 = arith.constant 2048 : i32
      %31 = vector.broadcast %c2048_i32 : i32 to vector<16x128xi32>
      %32 = arith.cmpi slt, %30, %31 : vector<16x128xi32>
      %cst_11 = arith.constant 0.000000e+00 : f32
      %33 = vector.broadcast %cst_11 : f32 to vector<16x128xf32>
      %34 = arith.select %32, %19, %33 : vector<16x128xi1>, vector<16x128xf32>
      %c0_12 = arith.constant 0 : index
      %c0_13 = arith.constant 0 : index
      %35 = vector.load %arg4[%c0_12, %c0_13] : memref<8x128xf32, #tpu.memory_space<vmem>>, vector<8x128xf32>
      %36 = vector.shape_cast %34 : vector<16x128xf32> to vector<2x8x128xf32>
      %cst_14 = arith.constant dense<0.000000e+00> : vector<8x128xf32>
      %37 = vector.multi_reduction <add>, %36, %cst_14 [0] : vector<2x8x128xf32> to vector<8x128xf32>
      %38 = arith.addf %35, %37 : vector<8x128xf32>
      %c0_15 = arith.constant 0 : index
      %c0_16 = arith.constant 0 : index
      %39 = vector.load %arg4[%c0_15, %c0_16] : memref<8x128xf32, #tpu.memory_space<vmem>>, vector<8x128xf32>
      tpu.vector_store %arg4[%c0_15, %c0_16], %38 {strides = array<i32>} : memref<8x128xf32, #tpu.memory_space<vmem>>, vector<8x128xf32>,
    } else {
    }
    return
  }
  func.func @transform_0(%arg0: i32, %arg1: i32) -> (i32, i32) {
    %c1_i32 = arith.constant 1 : i32
    %0 = arith.muli %arg0, %c1_i32 : i32
    %1 = arith.addi %0, %arg1 : i32
    %c0_i32 = arith.constant 0 : i32
    %2 = arith.minsi %1, %c0_i32 : i32
    %c0_i32_0 = arith.constant 0 : i32
    %c0_i32_1 = arith.constant 0 : i32
    return %2, %c0_i32_0 : i32, i32
  }
  func.func @transform_1(%arg0: i32, %arg1: i32) -> (i32, i32) {
    %c1_i32 = arith.constant 1 : i32
    %0 = arith.muli %arg0, %c1_i32 : i32
    %1 = arith.addi %0, %arg1 : i32
    %c0_i32 = arith.constant 0 : i32
    %2 = arith.minsi %1, %c0_i32 : i32
    %c0_i32_0 = arith.constant 0 : i32
    %c0_i32_1 = arith.constant 0 : i32
    return %2, %c0_i32_0 : i32, i32
  }
  func.func @transform_2(%arg0: i32, %arg1: i32) -> (i32, i32) {
    %c0_i32 = arith.constant 0 : i32
    %c0_i32_0 = arith.constant 0 : i32
    return %arg0, %c0_i32 : i32, i32
  }
}

</mosaic_0001>

<bundles_post_ra>
// kernel: weighted_binary_cross_entropy_loss.1
= control target key start
LH: loop header
LB: loop body
LE: loop exit
PB: predicated region body
PF: predicated region fallthrough
CT: control target
= control target key end

     0   :  { %s441_s9 = smov 0   ;;  %s443_s10 = smov 0   ;;  %s492_s0 = inlined_call_operand.vmem [shape: f32[16,128], index: 0, kind: input, shape index: {}]   ;;  %s493_s1 = inlined_call_operand.vmem [shape: f32[16,128], index: 1, kind: input, shape index: {}]   ;;  %s494_s2 = inlined_call_operand.vmem [shape: f32[16,128], index: 2, kind: output, shape index: {}]  }
   0x1   :  { %s445_s11 = smov 0  }
   0x2 LB: > { %s24_s12 = sadd.s32 1, %s419_s10  ;;  %p358_p0 = scmp.ge.s32.totalorder %s423_s11, 1  ;;  %s423_s11 = sphi %s445_s11, %s12_s11   ;;  %s419_s10 = sphi %s443_s10, %s496_s10   ;;  %s415_s9 = sphi %s441_s9, %s495_s9  }
   0x3   : > { %p26_p1 = scmp.ge.s32.totalorder %s24_s12, 2  ;;  %p160_p2 = scmp.lt.s32.totalorder %s423_s11, 3 }
   0x5   : > { %s498_s12 = smov (%p26_p1, %s24_s12), 0  ;;  %p161_p3 = pnand %p358_p0, %p160_p2 }
   0x6   : > { %p193_p4 = scmp.lt.s32.totalorder (!%p161_p3), %s415_s9, 0  ;;  %p216_p5 = scmp.lt.s32.totalorder (!%p161_p3), %s415_s9, 1  ;;  %v425_v0 = vmov (!%p161_p3), 0.0  }
   0x7   : > { %164 = sbr.rel (%p161_p3) target bundleno = 70 (0x46), region = 28  ;;  %p364_p7 = scmp.ge.s32.totalorder (!%p161_p3), %s415_s9, 0 }
   0xe   : > { %s194_s13 = scalar_select %p193_p4, %s415_s9, 0 }
   0xf   : > { %s217_s14 = scalar_select %p216_p5, %s415_s9, 1 }
  0x10   : > { %s359_s15 = sshll.u32 %s194_s13, 1 }
  0x11   : > { %p196_p6 = scmp.lt.s32.totalorder %s359_s15, 1  ;;  %s363_s16 = sshll.u32 %s217_s14, 3 }
  0x12   : > { %s468_s19 = scalar_lea.vmem %s494_s2, %s363_s16 }
  0x13   : > { %s500_s15 = smov (!%p196_p6, %s359_s15), 1  ;;  %225 = vst [vmem:[%s468_s19] sm:$0xff] %v425_v0 }
  0x14   : > { %s360_s20 = sshll.u32 %s500_s15, 3 }
  0x15   : > { %s211_s23 = scalar_lea.vmem %s493_s1, %s360_s20  ;;  %s199_s26 = scalar_lea.vmem %s492_s0, %s360_s20 }
  0x16   : > { %v228_v1 = vld [vmem:[%s211_s23] sm:$0xff]  ;;  %v229_v2 = vld [vmem:[%s211_s23 + $0x8] sm:$0xff] }
  0x17   : > { %v230_v3 = vadd.f32 1e-07, %v228_v1  ;;  %v236_v4 = vsub.f32 1.0, %v228_v1  ;;  %v231_v5 = vadd.f32 1e-07, %v229_v2  ;;  %v237_v6 = vsub.f32 1.0, %v229_v2 }
  0x18   : > { %v226_v17 = vld [vmem:[%s199_s26] sm:$0xff]  ;;  %v227_v20 = vld [vmem:[%s199_s26 + $0x8] sm:$0xff] }
  0x19   : > { %393 = vlog2.f32 %v230_v3  ;;  %v238_v7 = vadd.f32 1e-07, %v236_v4  ;;  %v239_v8 = vadd.f32 1e-07, %v237_v6 }
  0x1a   : > { %395 = vlog2.f32 %v231_v5  ;;  %v256_v27 = vld [vmem:[%s468_s19] sm:$0xff] (!%p364_p7) }
  0x1b   : > { %397 = vlog2.f32 %v238_v7 }
  0x1c   : > { %399 = vlog2.f32 %v239_v8 }
  0x23   : > { %v394_v9 = vpop.eup %393 }
  0x24   : > { %v396_v10 = vpop.eup %395  ;;  %v233_v11 = vmul.f32 0.6931472, %v394_v9 }
  0x25   : > { %v398_v12 = vpop.eup %397  ;;  %v235_v13 = vmul.f32 0.6931472, %v396_v10 }
  0x26   : > { %v400_v14 = vpop.eup %399  ;;  %v241_v15 = vmul.f32 0.6931472, %v398_v12  ;;  %v244_v16 = vmul.f32 2.0, %v233_v11 }
  0x27   : > { %v243_v18 = vmul.f32 0.6931472, %v400_v14  ;;  %v245_v19 = vmul.f32 2.0, %v235_v13  ;;  %255 = sbr.rel (%p364_p7) target bundleno = 52 (0x34), region = 36 }
  0x28   : > { %v246_v21 = vsub.f32 %v244_v16, %v241_v15 }
  0x29   : > { %v247_v22 = vsub.f32 %v245_v19, %v243_v18 }
  0x2a   : > { %v248_v23 = vmul.f32 %v246_v21, %v226_v17 }
  0x2b   : > { %v249_v24 = vmul.f32 %v247_v22, %v227_v20 }
  0x2c   : > { %v250_v25 = vadd.f32 %v248_v23, %v241_v15 }
  0x2d   : > { %v251_v26 = vadd.f32 %v249_v24, %v243_v18 }
  0x2f   : > { %v257_v28 = vadd.f32 %v251_v26, %v250_v25 }
  0x31   : > { %v258_v29 = vadd.f32 %v257_v28, %v256_v27 }
  0x33   : > { %259 = vst [vmem:[%s468_s19] sm:$0xff] %v258_v29 }
  0x34 PF: > { %p365_p8 = scmp.ne.s32.totalorder %s415_s9, 0 }
  0x35   : > { %v264_v30 = vlaneseq (!%p365_p8) }
  0x36   : > { %263 = sbr.rel (%p365_p8) target bundleno = 70 (0x46), region = 40 }
  0x37   : > { %v265_v31 = vshrl.u32 (!%p365_p8), %v264_v30, 7  ;;  %v268_v32 = vand.u32 (!%p365_p8), 127, %v264_v30 }
  0x39   : > { %v266_v33 = vadd.s32 (!%p365_p8), 8, %v265_v31  ;;  %v269_v34 = vmul.u32 (!%p365_p8), 128, %v265_v31 }
  0x3a   : > { %v277_v40 = vld [vmem:[%s468_s19] sm:$0xff] (!%p365_p8) }
  0x3b   : > { %v270_v35 = vmul.u32 (!%p365_p8), 128, %v266_v33  ;;  %v271_v36 = vadd.s32 (!%p365_p8), %v269_v34, %v268_v32 }
  0x3d   : > { %v272_v37 = vadd.s32 %v270_v35, %v268_v32  ;;  %vm273_vm0 = vcmp.lt.s32.totalorder %v271_v36, 2048 }
  0x3e   : > { %v275_v38 = vsel %vm273_vm0, %v250_v25, 0.0 }
  0x3f   : > { %vm274_vm1 = vcmp.lt.s32.totalorder %v272_v37, 2048 }
  0x40   : > { %v276_v39 = vsel %vm274_vm1, %v251_v26, 0.0 }
  0x41   : > { %v278_v41 = vadd.f32 %v276_v39, %v275_v38 }
  0x43   : > { %v279_v42 = vadd.f32 %v278_v41, %v277_v40 }
  0x45   : > { %280 = vst [vmem:[%s468_s19] sm:$0xff] %v279_v42 }
  0x46 PF: > { %s12_s11 = sadd.s32 1, %s423_s11   ;;  %s495_s9 = smov %s419_s10 }
  0x47   : > { %p9_p9 = scmp.ge.s32.totalorder %s12_s11, 4   ;;  %s496_s10 = smov %s498_s12 }
  0x49   :  { %11 = sbr.rel (!%p9_p9) target bundleno = 2 (0x2), region = 73 }

</bundles_post_ra>
